<compile_context>
chip_gen: v7x
topology: tpu7x:2x2x1
jax: 0.10.0
libtpu: 0.0.40
codegen_flags: <defaults>
</compile_context>

<pallas_src>
import functools

import jax
import jax.numpy as jnp
from jax.experimental import pallas as pl
from jax.experimental.pallas import tpu as pltpu

LANES = 128
MIN_SPLIT_BATCH = 512                    # below this, a single block wins on every chip
VMEM_BUDGET_BYTES = 24 * 1024 * 1024     # stay under v7x's 32 MiB scoped-VMEM default


def _round_up(x, m):
    return ((x + m - 1) // m) * m


# ----------------------------------------------------------------------------
# Kernel bodies
# ----------------------------------------------------------------------------
def _mlp_branch(s, a, w1s, w1a, b1, w2, b2, w3t, b3):
    """Fused 3-layer MLP.

    The first matmul is split across the (state, action) concat boundary; the
    degenerate (H2, 1) last layer is a VPU multiply + lane reduction against
    the transposed (1, H2) weight row (keeps the MXU off a 1-column result).
    Matmuls accumulate in f32 regardless of the storage/compute dtype.
    """
    h1 = jnp.dot(s, w1s, preferred_element_type=jnp.float32)
    h1 = h1 + jnp.dot(a, w1a, preferred_element_type=jnp.float32)
    h1 = jnp.maximum(h1 + b1, 0.0)
    h2 = jnp.dot(h1.astype(w2.dtype), w2, preferred_element_type=jnp.float32)
    h2 = jnp.maximum(h2 + b2, 0.0)
    return jnp.sum(h2 * w3t, axis=-1, keepdims=True) + b3       # (tile_b, 1)


def _critic_fwd_kernel(s_ref, a_ref, w1s_ref, w1a_ref, b1_ref, w2_ref, b2_ref,
                       w3t_ref, b3_ref, o_ref):
    q = _mlp_branch(s_ref[...], a_ref[...],
                    w1s_ref[...], w1a_ref[...], b1_ref[...],
                    w2_ref[...], b2_ref[...], w3t_ref[...], b3_ref[0])
    o_ref[...] = q.astype(o_ref.dtype)


def _critic_double_kernel(s_ref, a_ref,
                          w1s1_ref, w1a1_ref, b11_ref, w21_ref, b21_ref, w3t1_ref, b31_ref,
                          w1s2_ref, w1a2_ref, b12_ref, w22_ref, b22_ref, w3t2_ref, b32_ref,
                          o1_ref, o2_ref):
    s = s_ref[...]
    a = a_ref[...]
    q1 = _mlp_branch(s, a, w1s1_ref[...], w1a1_ref[...], b11_ref[...],
                     w21_ref[...], b21_ref[...], w3t1_ref[...], b31_ref[0])
    q2 = _mlp_branch(s, a, w1s2_ref[...], w1a2_ref[...], b12_ref[...],
                     w22_ref[...], b22_ref[...], w3t2_ref[...], b32_ref[0])
    o1_ref[...] = q1.astype(o1_ref.dtype)
    o2_ref[...] = q2.astype(o2_ref.dtype)


# ----------------------------------------------------------------------------
# Parameter prep (one-time, outside the hot path)
# ----------------------------------------------------------------------------
def init_mlp_params(key, dims):
    """Deterministic (xavier-uniform-like) init of an MLP with layer sizes `dims`."""
    params = []
    for i in range(len(dims) - 1):
        key, kw = jax.random.split(key)
        fan_in, fan_out = dims[i], dims[i + 1]
        limit = (6.0 / (fan_in + fan_out)) ** 0.5
        w = jax.random.uniform(kw, (fan_in, fan_out), jnp.float32, -limit, limit)
        b = jnp.zeros((1, fan_out), jnp.float32)
        params.append((w, b))
    return params


def prepare_critic_params(params, n_states, n_actions, compute_dtype=jnp.float32):
    """Split w1 across the concat boundary, transpose w3 into a (1, H2) row and
    zero-pad hidden dims to multiples of 128 so every operand is lane-dense.
    Padded columns carry zero weights/biases, so the math is unchanged.

    compute_dtype=jnp.bfloat16 stores the matmul weights (and expects the
    activation tiles) in bf16 — the fast path on v6e/v7x; keep f32 on v5e.
    Biases, the final weight row and MXU accumulation stay f32.
    """
    (w1, b1), (w2, b2), (w3, b3) = params
    d_in, h1 = w1.shape
    h2 = w2.shape[1]
    assert d_in == n_states + n_actions
    h1p = _round_up(h1, LANES)
    h2p = _round_up(h2, LANES)

    w1p = jnp.zeros((d_in, h1p), jnp.float32).at[:, :h1].set(w1)
    b1p = jnp.zeros((1, h1p), jnp.float32).at[:, :h1].set(b1.reshape(1, -1))
    w2p = jnp.zeros((h1p, h2p), jnp.float32).at[:h1, :h2].set(w2)
    b2p = jnp.zeros((1, h2p), jnp.float32).at[:, :h2].set(b2.reshape(1, -1))
    w3t = jnp.zeros((1, h2p), jnp.float32).at[:, :h2].set(w3.reshape(1, -1))
    b3p = b3.reshape(-1).astype(jnp.float32)            # (1,) scalar, rides in SMEM

    w1_s = w1p[:n_states].astype(compute_dtype)          # (n_states, H1p)
    w1_a = w1p[n_states:].astype(compute_dtype)          # (n_actions, H1p)
    w2p = w2p.astype(compute_dtype)
    return (w1_s, w1_a, b1p, w2p, b2p, w3t, b3p)


# ----------------------------------------------------------------------------
# Tiling / spec helpers
# ----------------------------------------------------------------------------
def _vmem_bytes_per_step(tb, n_states, n_actions, heads):
    """Rough per-grid-step VMEM footprint: double-buffered activation/output
    tiles + resident weights + f32 intermediates per head."""
    act_itemsize = heads[0][0].dtype.itemsize
    acts = 2 * tb * (n_states + n_actions) * act_itemsize       # 2x double-buffer
    outs = 2 * tb * 4 * len(heads)
    weights = sum(int(p.size) * p.dtype.itemsize for h in heads for p in h[:-1])
    inter = sum(tb * (h[0].shape[1] + h[3].shape[1]) * 4 for h in heads)
    return acts + outs + weights + inter


def _plan_tiling(batch, n_states, n_actions, heads, tile_b):
    """Return (tile_rows, num_tiles, padded_batch)."""
    if batch < MIN_SPLIT_BATCH:
        tb = _round_up(batch, 8)          # single block: fewest grid steps (v5e/v6e)
    else:
        # >= 2 tiles so ("parallel",) can shard across both v7x TensorCores.
        tb = _round_up(min(tile_b, pl.cdiv(batch, 2)), 8)
    # Shrink the tile if the per-step VMEM footprint would blow the budget (v7x).
    while tb > 8 and _vmem_bytes_per_step(tb, n_states, n_actions, heads) > VMEM_BUDGET_BYTES:
        tb = _round_up(tb // 2, 8)
    padded = _round_up(batch, tb)
    return tb, padded // tb, padded


def _pad_rows(x, padded_rows):
    pad = padded_rows - x.shape[0]
    return x if pad == 0 else jnp.pad(x, ((0, pad), (0, 0)))


def _act_spec(tb, d):
    return pl.BlockSpec((tb, d), lambda i: (i, 0))


def _param_specs(prepped):
    # Weights/biases: grid-invariant resident VMEM blocks (constant block index
    # -> no per-step re-DMA).  The scalar output bias b3 rides in SMEM.
    specs = [pl.BlockSpec(p.shape, lambda i: (0, 0)) for p in prepped[:-1]]
    specs.append(pl.BlockSpec(memory_space=pltpu.MemorySpace.SMEM))
    return specs


def _cost_estimate(rows, n_states, n_actions, heads):
    flops = 0
    bytes_accessed = rows * (n_states + n_actions) * heads[0][0].dtype.itemsize
    bytes_accessed += rows * 4 * len(heads)
    for h in heads:
        h1p, h2p = h[0].shape[1], h[3].shape[1]
        flops += 2 * rows * ((n_states + n_actions) * h1p + h1p * h2p + h2p)
        bytes_accessed += sum(int(p.size) * p.dtype.itemsize for p in h)
    return pl.CostEstimate(flops=flops, transcendentals=0,
                           bytes_accessed=bytes_accessed)


# ----------------------------------------------------------------------------
# pallas_call wrappers
# ----------------------------------------------------------------------------
@functools.partial(jax.jit, static_argnames=("tile_b",))
def critic_twin_forward(state, action, prepped_v1, tile_b=1024):
    """forward() of CriticTwin_mlp: value1(concat(state, action)) -> (B, 1)."""
    batch, n_states = state.shape
    n_actions = action.shape[1]
    heads = (prepped_v1,)
    tb, ng, padded = _plan_tiling(batch, n_states, n_actions, heads, tile_b)

    cdt = prepped_v1[0].dtype
    s = _pad_rows(state.astype(cdt), padded)
    a = _pad_rows(action.astype(cdt), padded)

    out = pl.pallas_call(
        _critic_fwd_kernel,
        out_shape=jax.ShapeDtypeStruct((padded, 1), jnp.float32),
        grid=(ng,),
        in_specs=[_act_spec(tb, n_states), _act_spec(tb, n_actions)]
                 + _param_specs(prepped_v1),
        out_specs=pl.BlockSpec((tb, 1), lambda i: (i, 0)),
        compiler_params=pltpu.CompilerParams(dimension_semantics=("parallel",)),
        cost_estimate=_cost_estimate(padded, n_states, n_actions, heads),
    )(s, a, *prepped_v1)
    return out[:batch]


@functools.partial(jax.jit, static_argnames=("tile_b",))
def critic_twin_get_double_q(state, action, prepped_v1, prepped_v2, tile_b=1024):
    """get_double_q(): both critic heads evaluated in a single fused kernel."""
    batch, n_states = state.shape
    n_actions = action.shape[1]
    heads = (prepped_v1, prepped_v2)
    tb, ng, padded = _plan_tiling(batch, n_states, n_actions, heads, tile_b)

    cdt = prepped_v1[0].dtype
    s = _pad_rows(state.astype(cdt), padded)
    a = _pad_rows(action.astype(cdt), padded)
    out_spec = pl.BlockSpec((tb, 1), lambda i: (i, 0))

    q1, q2 = pl.pallas_call(
        _critic_double_kernel,
        out_shape=(jax.ShapeDtypeStruct((padded, 1), jnp.float32),
                   jax.ShapeDtypeStruct((padded, 1), jnp.float32)),
        grid=(ng,),
        in_specs=[_act_spec(tb, n_states), _act_spec(tb, n_actions)]
                 + _param_specs(prepped_v1) + _param_specs(prepped_v2),
        out_specs=(out_spec, out_spec),
        compiler_params=pltpu.CompilerParams(dimension_semantics=("parallel",)),
        cost_estimate=_cost_estimate(padded, n_states, n_actions, heads),
    )(s, a, *prepped_v1, *prepped_v2)
    return q1[:batch], q2[:batch]


# ----------------------------------------------------------------------------
# Reference + self-test
# ----------------------------------------------------------------------------
def _reference_mlp(x, params):
    (w1, b1), (w2, b2), (w3, b3) = params
    h = jnp.maximum(x @ w1 + b1, 0.0)
    h = jnp.maximum(h @ w2 + b2, 0.0)
    return h @ w3 + b3


if __name__ == "__main__":
    # Small, deterministic shapes: batch=8, n_states=24, n_actions=8, hidden=(32, 32)
    batch, n_states, n_actions = 8, 24, 8
    hidden_units = (32, 32)
    dims = (n_states + n_actions,) + hidden_units + (1,)

    key = jax.random.PRNGKey(0)
    k_s, k_a, k_v1, k_v2 = jax.random.split(key, 4)

    state = jax.random.normal(k_s, (batch, n_states), jnp.float32)
    action = jax.random.normal(k_a, (batch, n_actions), jnp.float32)

    value1_raw = init_mlp_params(k_v1, dims)
    value2_raw = init_mlp_params(k_v2, dims)   # present in module; used by get_double_q
    value1_params = prepare_critic_params(value1_raw, n_states, n_actions)
    value2_params = prepare_critic_params(value2_raw, n_states, n_actions)

    cat = jnp.concatenate([state, action], axis=-1)
    ref1 = _reference_mlp(cat, value1_raw)
    ref2 = _reference_mlp(cat, value2_raw)

    # forward() — f32 path, single block.
    q1 = jax.block_until_ready(critic_twin_forward(state, action, value1_params))
    assert q1.shape == (batch, 1)
    assert jnp.allclose(q1, ref1, atol=1e-5, rtol=1e-5)

    # get_double_q() — single fused kernel, two (B, 1) outputs.
    q1d, q2d = jax.block_until_ready(
        critic_twin_get_double_q(state, action, value1_params, value2_params))
    assert jnp.allclose(q1d, ref1, atol=1e-5, rtol=1e-5)
    assert jnp.allclose(q2d, ref2, atol=1e-5, rtol=1e-5)

    # Ragged, larger batch: exercises padding + the >=2-tile ("parallel") path.
    big_b = 600
    kb_s, kb_a = jax.random.split(jax.random.PRNGKey(1))
    state_b = jax.random.normal(kb_s, (big_b, n_states), jnp.float32)
    action_b = jax.random.normal(kb_a, (big_b, n_actions), jnp.float32)
    refb = _reference_mlp(jnp.concatenate([state_b, action_b], axis=-1), value1_raw)
    qb = jax.block_until_ready(critic_twin_forward(state_b, action_b, value1_params))
    assert qb.shape == (big_b, 1)
    assert jnp.allclose(qb, refb, atol=1e-5, rtol=1e-5)

    # bf16 compute path (v6e/v7x fast path): loose tolerance vs the f32 reference.
    value1_bf16 = prepare_critic_params(value1_raw, n_states, n_actions,
                                        compute_dtype=jnp.bfloat16)
    qbf = jax.block_until_ready(critic_twin_forward(state_b, action_b, value1_bf16))
    assert qbf.shape == (big_b, 1)
    assert jnp.allclose(qbf, refb, atol=0.15, rtol=0.05)

    print("KERNEL_OK")
</pallas_src>

<mosaic_0001>
module attributes {stable_mosaic.version = 11 : i64} {
  func.func @_critic_fwd_kernel(%arg0: i32, %arg1: memref<8x24xf32, #tpu.memory_space<vmem>>, %arg2: memref<8x8xf32, #tpu.memory_space<vmem>>, %arg3: memref<24x128xf32, #tpu.memory_space<vmem>>, %arg4: memref<8x128xf32, #tpu.memory_space<vmem>>, %arg5: memref<1x128xf32, #tpu.memory_space<vmem>>, %arg6: memref<128x128xf32, #tpu.memory_space<vmem>>, %arg7: memref<1x128xf32, #tpu.memory_space<vmem>>, %arg8: memref<1x128xf32, #tpu.memory_space<vmem>>, %arg9: memref<1xf32, #tpu.memory_space<smem>>, %arg10: memref<8x1xf32, #tpu.memory_space<vmem>>) attributes {dimension_semantics = [#tpu.dimension_semantics<parallel>], iteration_bounds = array<i64: 1>, scalar_prefetch = 0 : i64, scratch_operands = 0 : i64, tpu.core_type = #tpu.core_type<tc>, window_params = [{transform_indices = @transform_0, window_bounds = array<i64: 8, 24>}, {transform_indices = @transform_1, window_bounds = array<i64: 8, 8>}, {pipeline_mode = #tpu.pipeline_mode<synchronous>, transform_indices = @transform_2, window_bounds = array<i64: 24, 128>}, {pipeline_mode = #tpu.pipeline_mode<synchronous>, transform_indices = @transform_3, window_bounds = array<i64: 8, 128>}, {pipeline_mode = #tpu.pipeline_mode<synchronous>, transform_indices = @transform_4, window_bounds = array<i64: 1, 128>}, {pipeline_mode = #tpu.pipeline_mode<synchronous>, transform_indices = @transform_5, window_bounds = array<i64: 128, 128>}, {pipeline_mode = #tpu.pipeline_mode<synchronous>, transform_indices = @transform_6, window_bounds = array<i64: 1, 128>}, {pipeline_mode = #tpu.pipeline_mode<synchronous>, transform_indices = @transform_7, window_bounds = array<i64: 1, 128>}, {transform_indices = @transform_8, window_bounds = array<i64: 1>}, {transform_indices = @transform_9, window_bounds = array<i64: 8, 1>}]} {
    %c0 = arith.constant 0 : index
    %c0_0 = arith.constant 0 : index
    %0 = vector.load %arg1[%c0, %c0_0] : memref<8x24xf32, #tpu.memory_space<vmem>>, vector<8x24xf32>
    %c0_1 = arith.constant 0 : index
    %c0_2 = arith.constant 0 : index
    %1 = vector.load %arg2[%c0_1, %c0_2] : memref<8x8xf32, #tpu.memory_space<vmem>>, vector<8x8xf32>
    %c0_3 = arith.constant 0 : index
    %c0_4 = arith.constant 0 : index
    %2 = vector.load %arg3[%c0_3, %c0_4] : memref<24x128xf32, #tpu.memory_space<vmem>>, vector<24x128xf32>
    %c0_5 = arith.constant 0 : index
    %c0_6 = arith.constant 0 : index
    %3 = vector.load %arg4[%c0_5, %c0_6] : memref<8x128xf32, #tpu.memory_space<vmem>>, vector<8x128xf32>
    %c0_7 = arith.constant 0 : index
    %c0_8 = arith.constant 0 : index
    %4 = vector.load %arg5[%c0_7, %c0_8] : memref<1x128xf32, #tpu.memory_space<vmem>>, vector<1x128xf32>
    %c0_9 = arith.constant 0 : index
    %c0_10 = arith.constant 0 : index
    %5 = vector.load %arg6[%c0_9, %c0_10] : memref<128x128xf32, #tpu.memory_space<vmem>>, vector<128x128xf32>
    %c0_11 = arith.constant 0 : index
    %c0_12 = arith.constant 0 : index
    %6 = vector.load %arg7[%c0_11, %c0_12] : memref<1x128xf32, #tpu.memory_space<vmem>>, vector<1x128xf32>
    %c0_13 = arith.constant 0 : index
    %c0_14 = arith.constant 0 : index
    %7 = vector.load %arg8[%c0_13, %c0_14] : memref<1x128xf32, #tpu.memory_space<vmem>>, vector<1x128xf32>
    %c0_15 = arith.constant 0 : index
    %8 = memref.load %arg9[%c0_15] : memref<1xf32, #tpu.memory_space<smem>>
    %cst = arith.constant dense<0.000000e+00> : vector<8x128xf32>
    %9 = tpu.matmul %0, %2, %cst {dimension_numbers = #tpu.dot_dimension_numbers<[1], [0], [0], [1], [0, 0, 1, 1], [], []>} : vector<8x24xf32>, vector<24x128xf32>, vector<8x128xf32> -> vector<8x128xf32>
    %cst_16 = arith.constant dense<0.000000e+00> : vector<8x128xf32>
    %10 = tpu.matmul %1, %3, %cst_16 {dimension_numbers = #tpu.dot_dimension_numbers<[1], [0], [0], [1], [0, 0, 1, 1], [], []>} : vector<8x8xf32>, vector<8x128xf32>, vector<8x128xf32> -> vector<8x128xf32>
    %11 = arith.addf %9, %10 : vector<8x128xf32>
    %12 = vector.broadcast %4 : vector<1x128xf32> to vector<8x128xf32>
    %13 = arith.addf %11, %12 : vector<8x128xf32>
    %cst_17 = arith.constant 0.000000e+00 : f32
    %14 = vector.broadcast %cst_17 : f32 to vector<8x128xf32>
    %15 = arith.maximumf %13, %14 : vector<8x128xf32>
    %cst_18 = arith.constant dense<0.000000e+00> : vector<8x128xf32>
    %16 = tpu.matmul %15, %5, %cst_18 {dimension_numbers = #tpu.dot_dimension_numbers<[1], [0], [0], [1], [0, 0, 1, 1], [], []>} : vector<8x128xf32>, vector<128x128xf32>, vector<8x128xf32> -> vector<8x128xf32>
    %17 = vector.broadcast %6 : vector<1x128xf32> to vector<8x128xf32>
    %18 = arith.addf %16, %17 : vector<8x128xf32>
    %cst_19 = arith.constant 0.000000e+00 : f32
    %19 = vector.broadcast %cst_19 : f32 to vector<8x128xf32>
    %20 = arith.maximumf %18, %19 : vector<8x128xf32>
    %21 = vector.broadcast %7 : vector<1x128xf32> to vector<8x128xf32>
    %22 = arith.mulf %20, %21 : vector<8x128xf32>
    %cst_20 = arith.constant dense<0.000000e+00> : vector<8xf32>
    %23 = vector.multi_reduction <add>, %22, %cst_20 [1] : vector<8x128xf32> to vector<8xf32>
    %24 = vector.shape_cast %23 : vector<8xf32> to vector<8x1xf32>
    %25 = vector.broadcast %8 : f32 to vector<8x1xf32>
    %26 = arith.addf %24, %25 : vector<8x1xf32>
    %c0_21 = arith.constant 0 : index
    %c0_22 = arith.constant 0 : index
    %27 = vector.load %arg10[%c0_21, %c0_22] : memref<8x1xf32, #tpu.memory_space<vmem>>, vector<8x1xf32>
    tpu.vector_store %arg10[%c0_21, %c0_22], %26 {strides = array<i32>} : memref<8x1xf32, #tpu.memory_space<vmem>>, vector<8x1xf32>,
    return
  }
  func.func @transform_0(%arg0: i32) -> (i32, i32) {
    %c0_i32 = arith.constant 0 : i32
    %c0_i32_0 = arith.constant 0 : i32
    return %arg0, %c0_i32 : i32, i32
  }
  func.func @transform_1(%arg0: i32) -> (i32, i32) {
    %c0_i32 = arith.constant 0 : i32
    %c0_i32_0 = arith.constant 0 : i32
    return %arg0, %c0_i32 : i32, i32
  }
  func.func @transform_2(%arg0: i32) -> (i32, i32) {
    %c0_i32 = arith.constant 0 : i32
    %c0_i32_0 = arith.constant 0 : i32
    %c0_i32_1 = arith.constant 0 : i32
    return %c0_i32, %c0_i32_0 : i32, i32
  }
  func.func @transform_3(%arg0: i32) -> (i32, i32) {
    %c0_i32 = arith.constant 0 : i32
    %c0_i32_0 = arith.constant 0 : i32
    %c0_i32_1 = arith.constant 0 : i32
    return %c0_i32, %c0_i32_0 : i32, i32
  }
  func.func @transform_4(%arg0: i32) -> (i32, i32) {
    %c0_i32 = arith.constant 0 : i32
    %c0_i32_0 = arith.constant 0 : i32
    %c0_i32_1 = arith.constant 0 : i32
    return %c0_i32, %c0_i32_0 : i32, i32
  }
  func.func @transform_5(%arg0: i32) -> (i32, i32) {
    %c0_i32 = arith.constant 0 : i32
    %c0_i32_0 = arith.constant 0 : i32
    %c0_i32_1 = arith.constant 0 : i32
    return %c0_i32, %c0_i32_0 : i32, i32
  }
  func.func @transform_6(%arg0: i32) -> (i32, i32) {
    %c0_i32 = arith.constant 0 : i32
    %c0_i32_0 = arith.constant 0 : i32
    %c0_i32_1 = arith.constant 0 : i32
    return %c0_i32, %c0_i32_0 : i32, i32
  }
  func.func @transform_7(%arg0: i32) -> (i32, i32) {
    %c0_i32 = arith.constant 0 : i32
    %c0_i32_0 = arith.constant 0 : i32
    %c0_i32_1 = arith.constant 0 : i32
    return %c0_i32, %c0_i32_0 : i32, i32
  }
  func.func @transform_8(%arg0: i32) -> i32 {
    %c0_i32 = arith.constant 0 : i32
    %c0_i32_0 = arith.constant 0 : i32
    return %c0_i32 : i32
  }
  func.func @transform_9(%arg0: i32) -> (i32, i32) {
    %c0_i32 = arith.constant 0 : i32
    %c0_i32_0 = arith.constant 0 : i32
    return %arg0, %c0_i32 : i32, i32
  }
}

</mosaic_0001>

<bundles_post_ra>
// kernel: critic_twin_forward.1
= control target key start
LH: loop header
LB: loop body
LE: loop exit
PB: predicated region body
PF: predicated region fallthrough
CT: control target
= control target key end

     0   :  { %15 = vsyncpa [#allocation4], 0  ;;  %s698_s0 = inlined_call_operand.hbm [shape: f32[8,24], index: 0, kind: input, shape index: {}]   ;;  %s699_s1 = inlined_call_operand.hbm [shape: f32[8,8], index: 1, kind: input, shape index: {}]   ;;  %s700_s2 = inlined_call_operand.hbm [shape: f32[24,128], index: 2, kind: input, shape index: {}]   ;;  %s701_s3 = inlined_call_operand.vmem [shape: f32[8,128], index: 3, kind: input, shape index: {}]   ;;  %s702_s4 = inlined_call_operand.vmem [shape: f32[1,128], index: 4, kind: input, shape index: {}]   ;;  %s703_s5 = inlined_call_operand.hbm [shape: f32[128,128], index: 5, kind: input, shape index: {}]   ;;  %s704_s6 = inlined_call_operand.vmem [shape: f32[1,128], index: 6, kind: input, shape index: {}]   ;;  %s705_s7 = inlined_call_operand.vmem [shape: f32[1,128], index: 7, kind: input, shape index: {}]   ;;  %s706_s8 = inlined_call_operand.<no memory space> [shape: f32[1], index: 8, kind: input, shape index: {}]   ;;  %s707_s9 = inlined_call_operand.vmem [shape: f32[8,1], index: 9, kind: output, shape index: {}]  }
   0x1   :  { %16 = vsyncpa [#allocation6], 0 }
   0x2   :  { %17 = vsyncpa [#allocation9], 0  ;;  %s570_s30 = smov [#allocation5]   ;;  %s571_s11 = smov [#allocation3]  }
   0x3   :  { %s34_s10 = sshll.u32 %s570_s30, 4  ;;  %s24_s12 = sshll.u32 %s571_s11, 4  ;;  %s35_s10 = int_to_ptr.vmem [resolvable:$true] %s34_s10  ;;  %s25_s12 = int_to_ptr.vmem [resolvable:$true] %s24_s12 }
   0x4   :  { %s476_s15 = scalar_lea.hbm %s699_s1, 128 }
   0x5   :  { %p477_p0 = scmp.ne.s32.totalorder %s699_s1, %s476_s15  ;;  %p480_p1 = scmp.lt.u32.totalorder %s476_s15, %s699_s1 }
   0x7   :  { %p482_p2 = pnand %p480_p1, %p477_p0 }
   0x9   :  { %485 = shalt.err (!%p482_p2)
}
   0xa   :  { %s486_s20 = scalar_lea.vmem %s35_s10, 128  ;;  %p491_p4 = scmp.lt.s32.totalorder %s35_s10, %s35_s10 }
   0xb   :  { %p487_p3 = scmp.ne.s32.totalorder %s35_s10, %s486_s20  ;;  %p492_p5 = scmp.lt.s32.totalorder %s486_s20, %s486_s20 }
   0xd   :  { %p493_p6 = por %p492_p5, %p491_p4 }
   0xf   :  { %p494_p7 = pnand %p493_p6, %p487_p3 }
  0x11   :  { %497 = shalt.err (!%p494_p7)
}
  0x12   :  { %37 = dma.hbm_to_vmem [thread:$0]  %s699_s1, 128, %s35_s10, [#allocation6]  }
  0x13   :  { %s498_s25 = scalar_lea.hbm %s698_s0, 128 }
  0x14   :  { %p499_p8 = scmp.ne.s32.totalorder %s698_s0, %s498_s25  ;;  %p502_p9 = scmp.lt.u32.totalorder %s498_s25, %s698_s0 }
  0x16   :  { %p504_p10 = pnand %p502_p9, %p499_p8 }
  0x18   :  { %507 = shalt.err (!%p504_p10)
}
  0x19   :  { %s508_s30 = scalar_lea.vmem %s25_s12, 128  ;;  %p513_p12 = scmp.lt.s32.totalorder %s25_s12, %s25_s12 }
  0x1a   :  { %p509_p11 = scmp.ne.s32.totalorder %s25_s12, %s508_s30  ;;  %p514_p13 = scmp.lt.s32.totalorder %s508_s30, %s508_s30 }
  0x1c   :  { %p515_p0 = por %p514_p13, %p513_p12 }
  0x1e   :  { %p516_p1 = pnand %p515_p0, %p509_p11 }
  0x20   :  { %519 = shalt.err (!%p516_p1)
}
  0x21   :  { %27 = dma.hbm_to_vmem [thread:$0]  %s698_s0, 128, %s25_s12, [#allocation4]  }
  0x22   :  { %s572_s11 = smov [#allocation7]   ;;  %s520_s16 = scalar_lea.hbm %s700_s2, 384 }
  0x23   :  { %s43_s13 = sshll.u32 %s572_s11, 4  ;;  %p521_p2 = scmp.ne.s32.totalorder %s700_s2, %s520_s16  ;;  %s44_s13 = int_to_ptr.vmem [resolvable:$true] %s43_s13 }
  0x24   :  { %p524_p3 = scmp.lt.u32.totalorder %s520_s16, %s700_s2 }
  0x26   :  { %p526_p4 = pnand %p524_p3, %p521_p2 }
  0x28   :  { %529 = shalt.err (!%p526_p4)
}
  0x29   :  { %s530_s21 = scalar_lea.vmem %s44_s13, 384  ;;  %p535_p6 = scmp.lt.s32.totalorder %s44_s13, %s44_s13 }
  0x2a   :  { %p531_p5 = scmp.ne.s32.totalorder %s44_s13, %s530_s21  ;;  %p536_p7 = scmp.lt.s32.totalorder %s530_s21, %s530_s21 }
  0x2c   :  { %p537_p8 = por %p536_p7, %p535_p6 }
  0x2e   :  { %p538_p9 = pnand %p537_p8, %p531_p5 }
  0x30   :  { %541 = shalt.err (!%p538_p9)
}
  0x31   :  { %s573_s0 = smov 128   ;;  %s574_s12 = smov 8  }
  0x32   :  { %49 = dma.hbm_to_vmem [thread:$0]  %s700_s2, 384, %s44_s13, [#allocation6], %s573_s0, %s573_s0, %s574_s12  }
  0x33   :  { %s575_s24 = smov [#allocation8]   ;;  %s542_s28 = scalar_lea.hbm %s703_s5, 2048 }
  0x34   :  { %s59_s25 = sshll.u32 %s575_s24, 4  ;;  %p543_p10 = scmp.ne.s32.totalorder %s703_s5, %s542_s28  ;;  %s60_s25 = int_to_ptr.vmem [resolvable:$true] %s59_s25 }
  0x35   :  { %p546_p11 = scmp.lt.u32.totalorder %s542_s28, %s703_s5 }
  0x37   :  { %p548_p12 = pnand %p546_p11, %p543_p10 }
  0x39   :  { %551 = shalt.err (!%p548_p12)
}
  0x3a   :  { %s552_s11 = scalar_lea.vmem %s60_s25, 2048  ;;  %p557_p0 = scmp.lt.s32.totalorder %s60_s25, %s60_s25 }
  0x3b   :  { %p553_p13 = scmp.ne.s32.totalorder %s60_s25, %s552_s11  ;;  %p558_p1 = scmp.lt.s32.totalorder %s552_s11, %s552_s11 }
  0x3d   :  { %p559_p2 = por %p558_p1, %p557_p0 }
  0x3f   :  { %p560_p3 = pnand %p559_p2, %p553_p13 }
  0x41   :  { %563 = shalt.err (!%p560_p3)
}
  0x42   :  { %65 = dma.hbm_to_vmem [thread:$0]  %s703_s5, 2048, %s60_s25, [#allocation9], %s573_s0, %s573_s0, %s574_s12  }
  0x43   :  { %564 = dma.done.wait [#allocation4], 128  }
  0x44   :  { %565 = vsyncadd [#allocation4], 4294967168 }
  0x45   :  { %566 = dma.done.wait [#allocation6], 512  }
  0x46   :  { %567 = vsyncadd [#allocation6], 4294966784 }
  0x47   :  { %568 = dma.done.wait [#allocation9], 2048  }
  0x48   :  { %569 = vsyncadd [#allocation9], 4294965248  ;;  %v576_v0 = vmov 0.0   ;;  %vm577_vm0 = vmmov 0   ;;  %v578_v1 = vmov 0.0|0.0   ;;  %vm110_vm1 = vcmask 64512  }
  0x49   :  { %391 = vmatprep.subr.mxu1 %v576_v0  ;;  %393 = vmatprep.mubr.msk.f32.mxu1 %vm577_vm0, %v576_v0  ;;  %v89_v2 = vld [vmem:[%s701_s3] sm:$0xff]  ;;  %v85_v3 = vld [vmem:[#allocation5] sm:$0xff]  ;;  %v86_v4 = vld [vmem:[#allocation7] sm:$0xff]  ;;  %vm184_vm2 = vcmask 195584   ;;  %v352_v48 = vstv %s706_s8  ;;  %vm354_vm3 = vcmask 7168  }
  0x4a   :  { %443 = vmatprep.subr.bf16.mxu0 %v578_v1  ;;  %437 = vmatprep.mubr.msk.f32.mxu0 %vm577_vm0, %v576_v0  ;;  %v87_v5 = vld [vmem:[#allocation7 + $0x8] sm:$0xff]  ;;  %v91_v7 = vld [vmem:[#allocation8] sm:$0xff]  ;;  %v92_v8 = vld [vmem:[#allocation8 + $0x8] sm:$0xff] }
  0x4b   :  { %392 = vmatpush3.msra.mxu1 %v89_v2  ;;  %v441_v6 = vpack.c.bf16 %v87_v5, %v86_v4  ;;  %v93_v9 = vld [vmem:[#allocation8 + $0x10] sm:$0xff]  ;;  %v444_v10 = vpack.c.bf16 %v92_v8, %v91_v7  ;;  %v94_v11 = vld [vmem:[#allocation8 + $0x18] sm:$0xff]  ;;  %v95_v15 = vld [vmem:[#allocation8 + $0x20] sm:$0xff] }
  0x4c   :  { %394 = vmatmul.mubr.msk.f32.vlgmr.msra.gmra.mrb[0].mxu1 %vm110_vm1, %v85_v3  ;;  %440 = vmatprep.subr.bf16.mxu1 %v578_v1  ;;  %v88_v12 = vld [vmem:[#allocation7 + $0x10] sm:$0xff]  ;;  %v447_v13 = vpack.c.bf16 %v94_v11, %v93_v9  ;;  %v96_v16 = vld [vmem:[#allocation8 + $0x28] sm:$0xff]  ;;  %v97_v18 = vld [vmem:[#allocation8 + $0x30] sm:$0xff] }
  0x4d   :  { %402 = vmatprep.mubr.msk.f32.mxu1 %vm577_vm0, %v576_v0  ;;  %442 = vmatpush3.bf16.msra.mxu1 %v441_v6  ;;  %v84_v14 = vld [vmem:[#allocation3] sm:$0xff]  ;;  %v450_v17 = vpack.c.bf16 %v96_v16, %v95_v15  ;;  %v99_v21 = vld [vmem:[#allocation8 + $0x40] sm:$0xff]  ;;  %v100_v22 = vld [vmem:[#allocation8 + $0x48] sm:$0xff] }
  0x4e   :  { %400 = vmatprep.subr.mxu1 %v576_v0  ;;  %445 = vmatpush3.bf16.msra.mxu0 %v444_v10  ;;  %v98_v19 = vld [vmem:[#allocation8 + $0x38] sm:$0xff]  ;;  %v456_v23 = vpack.c.bf16 %v100_v22, %v99_v21  ;;  %v101_v24 = vld [vmem:[#allocation8 + $0x50] sm:$0xff]  ;;  %v103_v27 = vld [vmem:[#allocation8 + $0x60] sm:$0xff] }
  0x4f   :  { %446 = vmatprep.subr.bf16.mxu0 %v578_v1  ;;  %v453_v20 = vpack.c.bf16 %v98_v19, %v97_v18  ;;  %v102_v25 = vld [vmem:[#allocation8 + $0x58] sm:$0xff]  ;;  %v104_v28 = vld [vmem:[#allocation8 + $0x68] sm:$0xff]  ;;  %v105_v30 = vld [vmem:[#allocation8 + $0x70] sm:$0xff] }
  0x50   :  { %v459_v26 = vpack.c.bf16 %v102_v25, %v101_v24  ;;  %v462_v29 = vpack.c.bf16 %v104_v28, %v103_v27  ;;  %v106_v31 = vld [vmem:[#allocation8 + $0x78] sm:$0xff] }
  0x51   :  { %401 = vmatpush3.msra.mxu1 %v88_v12  ;;  %v465_v32 = vpack.c.bf16 %v106_v31, %v105_v30  ;;  %v365_v35 = vld [vmem:[%s702_s4] ss:$0 sm:$0xff] }
  0x52   :  { %403 = vmatmul.mubr.msk.f32.vlgmr.msra.gmra.mrb[2].mxu1 %vm184_vm2, %v84_v14  ;;  %448 = vmatpush3.bf16.msra.mxu0 %v447_v13  ;;  %v366_v41 = vld [vmem:[%s704_s6] ss:$0 sm:$0xff] }
  0x53   :  { %449 = vmatprep.subr.bf16.mxu0 %v578_v1  ;;  %v367_v45 = vld [vmem:[%s705_s7] ss:$0 sm:$0xff] }
  0x56   :  { %451 = vmatpush3.bf16.msra.mxu0 %v450_v17 }
  0x57   :  { %452 = vmatprep.subr.bf16.mxu0 %v578_v1 }
  0x5a   :  { %454 = vmatpush3.bf16.msra.mxu0 %v453_v20 }
  0x5b   :  { %455 = vmatprep.subr.bf16.mxu0 %v578_v1 }
  0x5e   :  { %457 = vmatpush3.bf16.msra.mxu0 %v456_v23 }
  0x5f   :  { %458 = vmatprep.subr.bf16.mxu0 %v578_v1 }
  0x62   :  { %460 = vmatpush3.bf16.msra.mxu0 %v459_v26 }
  0x63   :  { %461 = vmatprep.subr.bf16.mxu0 %v578_v1 }
  0x66   :  { %463 = vmatpush3.bf16.msra.mxu0 %v462_v29 }
  0x67   :  { %464 = vmatprep.subr.bf16.mxu0 %v578_v1 }
  0x6a   :  { %466 = vmatpush3.bf16.msra.mxu0 %v465_v32 }
 0x11f   :  { %v180_v33 = vpop.f32.mrb[0].mxu1 }
 0x120   :  { %v395_v34 = vpop.f32.mrb[1].mxu1 }
 0x125   :  { %v254_v36 = vpop.f32.mrb[2].mxu1 }
 0x126   :  { %v255_v37 = vadd.f32 %v254_v36, %v180_v33  ;;  %v404_v38 = vpop.f32.mrb[3].mxu1 }
 0x128   :  { %v264_v39 = vadd.f32 %v365_v35, %v255_v37 }
 0x12a   :  { %v265_v40 = vmax.f32 %v264_v39, 0.0 }
 0x12c   :  { %438 = vmatmul.mubr.f32.vlgmr.msra.gmra.mrb[0].mxu0 %v265_v40 }
 0x1ff   :  { %v338_v42 = vpop.f32.mrb[0].mxu0 }
 0x200   :  { %v339_v43 = vadd.f32 %v366_v41, %v338_v42  ;;  %v439_v44 = vpop.f32.mrb[1].mxu0 }
 0x202   :  { %v342_v46 = vmax.f32 %v339_v43, 0.0 }
 0x204   :  { %v349_v47 = vmul.f32 %v367_v45, %v342_v46 }
 0x206   :  { %350 = vadd.xlane.f32.xlu0 %v349_v47 }
 0x293   :  { %v351_v49 = vpop.xlane.xlu0 %350 }
 0x294   :  { %v353_v50 = vadd.f32 %v352_v48, %v351_v49 }
 0x296   :  { %355 = vst.msk [vmem:[%s707_s9] sm:$0xff] %vm354_vm3, %v353_v50 }
 0x297   :  { %360 = vsyncpa [#allocation4], 1 }
 0x298   :  { %361 = vsyncpa [#allocation6], 1 }
 0x299   :  { %362 = vsyncpa [#allocation9], 1 }

</bundles_post_ra>
